<compile_context>
chip_gen: v7x
topology: tpu7x:2x2x1
jax: 0.10.0
libtpu: 0.0.40
codegen_flags: <defaults>
</compile_context>

<pallas_src>
import functools

import jax
import jax.numpy as jnp
from jax.experimental import pallas as pl
from jax.experimental.pallas import tpu as pltpu

_LANES = 128


def _whiten_kernel(state_ref, x_ref, out_ref, new_state_ref, *,
                   n, n_pad, momentum, epsilon):
    # x_ref/out_ref: (rows, 128) in VMEM ; state_ref/new_state_ref: (3,) f32 SMEM.
    x = x_ref[...].astype(jnp.float32)

    # Batch mean: the padded tail is zero in HBM, so the whole-slab sum is exact.
    batch_mean = jnp.sum(x) / n

    # Unbiased variance (torch.var_mean, ddof=1).  Two-pass form over the whole
    # padded slab; each of the (n_pad - n) zero pads contributes exactly
    # batch_mean^2 to the sum of squared deviations, subtracted as a scalar.
    # NOTE: n == 1 gives 0/0 -> NaN, matching torch's unbiased variance.
    d = x - batch_mean
    total_sq = jnp.sum(d * d)
    batch_var = (total_sq - (n_pad - n) * batch_mean * batch_mean) / (n - 1)

    old_mean = state_ref[0]
    old_var = state_ref[1]
    has_trained = state_ref[2] > 0.5

    new_mean = jnp.where(
        has_trained, (1.0 - momentum) * old_mean + momentum * batch_mean, batch_mean
    )
    new_var = jnp.where(
        has_trained, (1.0 - momentum) * old_var + momentum * batch_var, batch_var
    )

    # Single EUP rsqrt; whitening pass is one vsub + one vmul per vreg,
    # reading x straight from the resident VMEM input buffer.
    inv_std = jax.lax.rsqrt(new_var + epsilon)
    out_ref[...] = ((x - new_mean) * inv_std).astype(out_ref.dtype)

    new_state_ref[0] = new_mean
    new_state_ref[1] = new_var
    new_state_ref[2] = 1.0  # has_trained <- True


def reward_whitener_init():
    """Packed running state [mean, var, has_trained] matching module __init__."""
    return jnp.array([0.0, 1.0, 0.0], dtype=jnp.float32)


@functools.partial(jax.jit, static_argnames=("momentum", "epsilon"))
def reward_whitener_forward(rewards, state, momentum=0.025, epsilon=1e-8):
    """Functional forward. Returns (whitened, new_packed_state)."""
    assert rewards.ndim == 1
    n = rewards.shape[0]

    # Lane-dense (rows, 128) slab; pad only to a multiple of 128.
    rows = pl.cdiv(n, _LANES)
    n_pad = rows * _LANES
    x2d = jnp.pad(rewards, (0, n_pad - n)).reshape(rows, _LANES)

    kernel = functools.partial(
        _whiten_kernel, n=n, n_pad=n_pad,
        momentum=float(momentum), epsilon=float(epsilon),
    )

    whitened2d, new_state = pl.pallas_call(
        kernel,
        out_shape=(
            jax.ShapeDtypeStruct((rows, _LANES), rewards.dtype),
            jax.ShapeDtypeStruct((3,), jnp.float32),
        ),
        in_specs=[
            pl.BlockSpec(memory_space=pltpu.SMEM),   # packed running state
            pl.BlockSpec(memory_space=pltpu.VMEM),   # rewards slab
        ],
        out_specs=(
            pl.BlockSpec(memory_space=pltpu.VMEM),   # whitened rewards
            pl.BlockSpec(memory_space=pltpu.SMEM),   # updated state
        ),
        input_output_aliases={0: 1},                 # state in -> state out
    )(state, x2d)

    whitened = whitened2d.reshape(n_pad)[:n]
    return whitened, new_state


def _reference(rewards, mean, var, has_trained, momentum=0.025, epsilon=1e-8):
    r = rewards.astype(jnp.float32)
    m = jnp.mean(r)
    v = jnp.sum((r - m) ** 2) / (r.shape[0] - 1)
    new_mean = jnp.where(has_trained, (1 - momentum) * mean + momentum * m, m)
    new_var = jnp.where(has_trained, (1 - momentum) * var + momentum * v, v)
    return (r - new_mean) / jnp.sqrt(new_var + epsilon), new_mean, new_var


if __name__ == "__main__":
    key = jax.random.PRNGKey(0)

    # Persistent packed buffer state, as the module's registered buffers.
    state = reward_whitener_init()

    # First call (has_trained=False path); n not a multiple of 1024.
    n = 256
    rewards = jax.random.normal(key, (n,), dtype=jnp.float32) * 2.0 + 0.5
    out1, state = reward_whitener_forward(rewards, state)
    jax.block_until_ready(out1)

    ref1, ref_mean, ref_var = _reference(rewards, 0.0, 1.0, False)
    assert jnp.allclose(out1, ref1, atol=1e-4, rtol=1e-4)
    assert jnp.allclose(state[0], ref_mean, atol=1e-5)
    assert jnp.allclose(state[1], ref_var, atol=1e-4)
    assert bool(state[2] > 0.5)

    # Second call (has_trained=True path, EMA update of running stats).
    key2 = jax.random.PRNGKey(1)
    rewards2 = jax.random.normal(key2, (n,), dtype=jnp.float32) * 3.0 - 1.0
    out2, state2 = reward_whitener_forward(rewards2, state)
    jax.block_until_ready(out2)

    ref2, ref_mean2, ref_var2 = _reference(rewards2, state[0], state[1], True)
    assert jnp.allclose(out2, ref2, atol=1e-4, rtol=1e-4)
    assert jnp.allclose(state2[0], ref_mean2, atol=1e-5)
    assert jnp.allclose(state2[1], ref_var2, atol=1e-4)

    # Third call with a length not a multiple of 128 (exercises padding path).
    key3 = jax.random.PRNGKey(2)
    n3 = 300
    rewards3 = jax.random.normal(key3, (n3,), dtype=jnp.float32) * 0.7 + 2.0
    out3, state3 = reward_whitener_forward(rewards3, state2)
    jax.block_until_ready(out3)
    ref3, ref_mean3, ref_var3 = _reference(rewards3, state2[0], state2[1], True)
    assert jnp.allclose(out3, ref3, atol=1e-4, rtol=1e-4)
    assert jnp.allclose(state3[0], ref_mean3, atol=1e-5)
    assert jnp.allclose(state3[1], ref_var3, atol=1e-4)

    print("KERNEL_OK")
</pallas_src>

<mosaic_0001>
module attributes {stable_mosaic.version = 11 : i64} {
  func.func @_whiten_kernel(%arg0: memref<3xf32, #tpu.memory_space<smem>>, %arg1: memref<2x128xf32, #tpu.memory_space<vmem>>, %arg2: memref<2x128xf32, #tpu.memory_space<vmem>>, %arg3: memref<3xf32, #tpu.memory_space<smem>>) attributes {dimension_semantics = [], scalar_prefetch = 0 : i64, scratch_operands = 0 : i64, tpu.core_type = #tpu.core_type<tc>} {
    %c0 = arith.constant 0 : index
    %c0_0 = arith.constant 0 : index
    %0 = vector.load %arg1[%c0, %c0_0] : memref<2x128xf32, #tpu.memory_space<vmem>>, vector<2x128xf32>
    %1 = vector.shape_cast %0 : vector<2x128xf32> to vector<1x2x128xf32>
    %cst = arith.constant dense<0.000000e+00> : vector<1xf32>
    %2 = vector.multi_reduction <add>, %1, %cst [1, 2] : vector<1x2x128xf32> to vector<1xf32>
    %3 = vector.shape_cast %2 : vector<1xf32> to vector<1x1x1xf32>
    %4 = vector.extract %3[0, 0, 0] : f32 from vector<1x1x1xf32>
    %cst_1 = arith.constant 2.560000e+02 : f32
    %5 = arith.divf %4, %cst_1 : f32
    %6 = vector.broadcast %5 : f32 to vector<2x128xf32>
    %7 = arith.subf %0, %6 : vector<2x128xf32>
    %8 = arith.mulf %7, %7 : vector<2x128xf32>
    %9 = vector.shape_cast %8 : vector<2x128xf32> to vector<1x2x128xf32>
    %cst_2 = arith.constant dense<0.000000e+00> : vector<1xf32>
    %10 = vector.multi_reduction <add>, %9, %cst_2 [1, 2] : vector<1x2x128xf32> to vector<1xf32>
    %11 = vector.shape_cast %10 : vector<1xf32> to vector<1x1x1xf32>
    %12 = vector.extract %11[0, 0, 0] : f32 from vector<1x1x1xf32>
    %cst_3 = arith.constant 0.000000e+00 : f32
    %13 = arith.mulf %cst_3, %5 : f32
    %14 = arith.mulf %13, %5 : f32
    %15 = arith.subf %12, %14 : f32
    %cst_4 = arith.constant 2.550000e+02 : f32
    %16 = arith.divf %15, %cst_4 : f32
    %c0_5 = arith.constant 0 : index
    %17 = memref.load %arg0[%c0_5] : memref<3xf32, #tpu.memory_space<smem>>
    %c1 = arith.constant 1 : index
    %18 = memref.load %arg0[%c1] : memref<3xf32, #tpu.memory_space<smem>>
    %c2 = arith.constant 2 : index
    %19 = memref.load %arg0[%c2] : memref<3xf32, #tpu.memory_space<smem>>
    %cst_6 = arith.constant 5.000000e-01 : f32
    %20 = arith.cmpf ogt, %19, %cst_6 : f32
    %cst_7 = arith.constant 9.750000e-01 : f32
    %21 = arith.mulf %cst_7, %17 : f32
    %cst_8 = arith.constant 2.500000e-02 : f32
    %22 = arith.mulf %cst_8, %5 : f32
    %23 = arith.addf %21, %22 : f32
    %24 = arith.select %20, %23, %5 : f32
    %cst_9 = arith.constant 9.750000e-01 : f32
    %25 = arith.mulf %cst_9, %18 : f32
    %cst_10 = arith.constant 2.500000e-02 : f32
    %26 = arith.mulf %cst_10, %16 : f32
    %27 = arith.addf %25, %26 : f32
    %28 = arith.select %20, %27, %16 : f32
    %cst_11 = arith.constant 9.99999993E-9 : f32
    %29 = arith.addf %28, %cst_11 : f32
    %30 = math.rsqrt %29 : f32
    %31 = vector.broadcast %24 : f32 to vector<2x128xf32>
    %32 = arith.subf %0, %31 : vector<2x128xf32>
    %33 = vector.broadcast %30 : f32 to vector<2x128xf32>
    %34 = arith.mulf %32, %33 : vector<2x128xf32>
    %c0_12 = arith.constant 0 : index
    %c0_13 = arith.constant 0 : index
    %35 = vector.load %arg2[%c0_12, %c0_13] : memref<2x128xf32, #tpu.memory_space<vmem>>, vector<2x128xf32>
    tpu.vector_store %arg2[%c0_12, %c0_13], %34 {strides = array<i32>} : memref<2x128xf32, #tpu.memory_space<vmem>>, vector<2x128xf32>,
    %c0_14 = arith.constant 0 : index
    %36 = memref.load %arg3[%c0_14] : memref<3xf32, #tpu.memory_space<smem>>
    memref.store %24, %arg3[%c0_14] : memref<3xf32, #tpu.memory_space<smem>>
    %c1_15 = arith.constant 1 : index
    %37 = memref.load %arg3[%c1_15] : memref<3xf32, #tpu.memory_space<smem>>
    memref.store %28, %arg3[%c1_15] : memref<3xf32, #tpu.memory_space<smem>>
    %cst_16 = arith.constant 1.000000e+00 : f32
    %c2_17 = arith.constant 2 : index
    %38 = memref.load %arg3[%c2_17] : memref<3xf32, #tpu.memory_space<smem>>
    memref.store %cst_16, %arg3[%c2_17] : memref<3xf32, #tpu.memory_space<smem>>
    return
  }
}

</mosaic_0001>

<bundles_post_ra>
// kernel: reward_whitener_forward.1
= control target key start
LH: loop header
LB: loop body
LE: loop exit
PB: predicated region body
PF: predicated region fallthrough
CT: control target
= control target key end

     0   :  { %9 = vsyncpa [#allocation4], 0  ;;  %s248_s0 = inlined_call_operand.vmem [shape: f32[3], index: 0, kind: input, shape index: {}, may-alias: {0,3}]   ;;  %s249_s1 = inlined_call_operand.vmem [shape: f32[2,128], index: 1, kind: input, shape index: {}]   ;;  %s250_s2 = inlined_call_operand.hbm [shape: f32[2,128], index: 2, kind: output, shape index: {0}]   ;;  %s251_s3 = inlined_call_operand.vmem [shape: f32[3], index: 3, kind: output, shape index: {1}, may-alias: {0,3}]  }
   0x1   :  { %10 = vsyncpa [#allocation3], 0 }
   0x2   :  { %11 = vsyncpa [#allocation5], 0  ;;  %s18_s14 = sshll.u32 %s248_s0, 4  ;;  %s19_s14 = int_to_ptr.vmem [resolvable:$true] %s18_s14 }
   0x3   :  { %s133_s15 = scalar_lea.vmem %s19_s14, 16  ;;  %p138_p1 = scmp.lt.s32.totalorder %s19_s14, %s19_s14 }
   0x4   :  { %p134_p0 = scmp.ne.s32.totalorder %s19_s14, %s133_s15  ;;  %p139_p2 = scmp.lt.s32.totalorder %s133_s15, %s133_s15 }
   0x6   :  { %p140_p3 = por %p139_p2, %p138_p1 }
   0x8   :  { %p141_p4 = pnand %p140_p3, %p134_p0 }
   0xa   :  { %144 = shalt.err (!%p141_p4)
}
   0xb   :  { %s185_s16 = smov [#allocation2]  }
   0xc   :  { %21 = dma.vmem_to_smem %s19_s14, 16, %s185_s16, [#allocation4]  }
   0xd   :  { %179 = dma.done.wait [#allocation4], 16  }
   0xe   :  { %180 = vsyncadd [#allocation4], 4294967280 }
   0xf   :  { %27 = sfence }
  0x10   :  { %v215_v0 = vld [vmem:[%s249_s1] sm:$0x3]  ;;  %vm29_vm0 = vcmask 1041408   ;;  %s62_s0 = sld [smem:[#allocation2]]  ;;  %s219_s19 = sld [smem:[#allocation2 + $0x2]] }
  0x11   :  { %v30_v1 = vsel %vm29_vm0, %v215_v0, 0.0  ;;  %s186_s24 = smov 1.0   ;;  %s119_s25 = sld [smem:[#allocation2 + $0x1]] }
  0x12   :  { %31 = vadd.xlane.f32.xlu0 %v30_v1  ;;  %88 = sst [smem:[#allocation7 + $0x2]] %s186_s24  ;;  %s105_s9 = sshll.u32 %s251_s3, 4  ;;  %s106_s9 = int_to_ptr.vmem [resolvable:$true] %s105_s9 }
  0x13   :  { %s145_s11 = scalar_lea.vmem %s106_s9, 16  ;;  %p150_p7 = scmp.lt.s32.totalorder %s106_s9, %s106_s9 }
  0x14   :  { %p146_p6 = scmp.ne.s32.totalorder %s106_s9, %s145_s11  ;;  %p151_p8 = scmp.lt.s32.totalorder %s145_s11, %s145_s11 }
  0x16   :  { %s66_s21 = smul.f32 0.975, %s62_s0  ;;  %p65_p5 = scmp.gt.f32.partialorder %s219_s19, 0.5 }
  0x17   :  { %s70_s30 = smul.f32 0.975, %s119_s25  ;;  %p152_p9 = por %p151_p8, %p150_p7 }
  0x19   :  { %p153_p10 = pnand %p152_p9, %p146_p6 }
  0x9f   :  { %v32_v2 = vpop.xlane.xlu0 %31 }
  0xa0   :  { %v33_v3 = vrot.slane %v32_v2, 4 }
  0xa2   :  { %v34_v4 = vadd.f32 %v33_v3, %v32_v2 }
  0xa4   :  { %v35_v5 = vrot.slane %v34_v4, 2 }
  0xa6   :  { %v36_v6 = vadd.f32 %v35_v5, %v34_v4 }
  0xa8   :  { %v37_v7 = vrot.slane %v36_v6, 1 }
  0xaa   :  { %v38_v8 = vadd.f32 %v37_v7, %v36_v6 }
  0xac   :  { %121 = vpush %v38_v8 }
  0xdd   :  { %s122_s1 = spop %121 }
  0xde   :  { %s42_s20 = smul.f32 0.00390625, %s122_s1 }
  0xe0   :  { %v43_v9 = vstv %s42_s20  ;;  %s67_s22 = smul.f32 0.025, %s42_s20 }
  0xe1   :  { %v44_v10 = vsub.f32 %v215_v0, %v43_v9  ;;  %s56_s26 = smul.f32 0.0, %s42_s20 }
  0xe2   :  { %s68_s23 = sadd.f32 %s67_s22, %s66_s21 }
  0xe3   :  { %v45_v11 = vmul.f32 %v44_v10, %v44_v10  ;;  %s57_s27 = smul.f32 %s56_s26, %s42_s20 }
  0xe4   :  { %s253_s23 = smov (!%p65_p5, %s68_s23), %s42_s20 }
  0xe5   :  { %v46_v12 = vsel %vm29_vm0, %v45_v11, 0.0  ;;  %84 = sst [smem:[#allocation7]] %s253_s23 }
  0xe6   :  { %47 = vadd.xlane.f32.xlu0 %v46_v12 }
 0x173   :  { %v48_v13 = vpop.xlane.xlu0 %47 }
 0x174   :  { %v49_v14 = vrot.slane %v48_v13, 4 }
 0x176   :  { %v50_v15 = vadd.f32 %v49_v14, %v48_v13 }
 0x178   :  { %v51_v16 = vrot.slane %v50_v15, 2 }
 0x17a   :  { %v52_v17 = vadd.f32 %v51_v16, %v50_v15 }
 0x17c   :  { %v53_v18 = vrot.slane %v52_v17, 1 }
 0x17e   :  { %v54_v19 = vadd.f32 %v53_v18, %v52_v17 }
 0x180   :  { %123 = vpush %v54_v19 }
 0x1b1   :  { %s124_s28 = spop %123 }
 0x1b2   :  { %s58_s29 = ssub.f32 %s124_s28, %s57_s27 }
 0x1b4   :  { %s61_s4 = smul.f32 0.003921569, %s58_s29 }
 0x1b6   :  { %s71_s5 = smul.f32 0.025, %s61_s4 }
 0x1b8   :  { %s72_s6 = sadd.f32 %s71_s5, %s70_s30 }
 0x1ba   :  { %s255_s6 = smov (!%p65_p5, %s72_s6), %s61_s4 }
 0x1bb   :  { %s74_s10 = sadd.f32 1e-08, %s255_s6 }
 0x1bc   :  { %86 = sst [smem:[#allocation7 + $0x1]] %s255_s6 }
 0x1bd   :  { %v75_v20 = vstv %s74_s10 }
 0x1be   :  { %156 = shalt.err (!%p153_p10)
}
 0x1bf   :  { %s187_s12 = smov [#allocation7]   ;;  %131 = vrsqrt.f32 %v75_v20  ;;  %v78_v22 = vstv %s253_s23  ;;  %s188_s3 = smov [#allocation6]  }
 0x1c0   :  { %108 = dma.smem_to_vmem %s187_s12, 16, %s106_s9, [#allocation5]   ;;  %v79_v23 = vsub.f32 %v215_v0, %v78_v22 }
 0x1c1   :  { %s95_s13 = sshll.u32 %s188_s3, 4  ;;  %s96_s13 = int_to_ptr.vmem [resolvable:$true] %s95_s13 }
 0x1c2   :  { %s157_s15 = scalar_lea.vmem %s96_s13, 32  ;;  %p162_p12 = scmp.lt.s32.totalorder %s96_s13, %s96_s13 }
 0x1c3   :  { %p158_p11 = scmp.ne.s32.totalorder %s96_s13, %s157_s15  ;;  %p163_p13 = scmp.lt.s32.totalorder %s157_s15, %s157_s15 }
 0x1c5   :  { %p164_p0 = por %p163_p13, %p162_p12 }
 0x1c7   :  { %p165_p1 = pnand %p164_p0, %p158_p11 }
 0x1c9   :  { %v132_v21 = vpop.eup %131 }
 0x1ca   :  { %125 = vpush %v132_v21 }
 0x1fb   :  { %s126_s14 = spop %125 }
 0x1fc   :  { %v80_v24 = vstv %s126_s14 }
 0x1fd   :  { %v81_v25 = vmul.f32 %v80_v24, %v79_v23 }
 0x1ff   :  { %82 = vst [vmem:[#allocation6] sm:$0x3] %v81_v25 }
 0x200   :  { %168 = shalt.err (!%p165_p1)
}
 0x201   :  { %s169_s18 = scalar_lea.hbm %s250_s2, 32 }
 0x202   :  { %p170_p2 = scmp.ne.s32.totalorder %s250_s2, %s169_s18  ;;  %p173_p3 = scmp.lt.u32.totalorder %s169_s18, %s250_s2 }
 0x204   :  { %p175_p4 = pnand %p173_p3, %p170_p2 }
 0x206   :  { %178 = shalt.err (!%p175_p4)
}
 0x207   :  { %98 = dma.vmem_to_hbm [thread:$0]  %s96_s13, 32, %s250_s2, [#allocation3]  }
 0x208   :  { %181 = dma.done.wait [#allocation3], 32  }
 0x209   :  { %182 = vsyncadd [#allocation3], 4294967264 }
 0x20a   :  { %183 = dma.done.wait [#allocation5], 16  }
 0x20b   :  { %184 = vsyncadd [#allocation5], 4294967280 }
 0x20c   :  { %115 = sfence }
 0x20d   :  { %116 = vsyncpa [#allocation3], 1 }
 0x20e   :  { %117 = vsyncpa [#allocation4], 1 }
 0x20f   :  { %118 = vsyncpa [#allocation5], 1 }

</bundles_post_ra>
